<compile_context>
chip_gen: v7x
topology: tpu7x:2x2x1
jax: 0.10.0
libtpu: 0.0.40
codegen_flags: <defaults>
</compile_context>

<pallas_src>
import jax
import jax.numpy as jnp
from jax.experimental import pallas as pl
from jax.experimental.pallas import tpu as pltpu

_HALO = 8  # carried history rows (>= K-1, one full sublane tile so ops stay aligned)


def _round_up(n, m):
    return ((n + m - 1) // m) * m


def _context_conv_kernel(x_ref, w_ref, b_ref, o_ref, carry_ref):
    # x_ref:     (TT, Cin)       current time block of one batch element
    # w_ref:     (K, Cin, Cout)  w_ref[j, c, o] = weight[o, c, j]
    # b_ref:     (1, Cout)
    # o_ref:     (TT, Cout)
    # carry_ref: (_HALO, Cin)    last _HALO input rows of the previous time block
    t = pl.program_id(1)
    K = w_ref.shape[0]
    TT = x_ref.shape[0]

    # Causal zero padding: at the start of each batch element the carried
    # history is all zeros.
    @pl.when(t == 0)
    def _():
        carry_ref[...] = jnp.zeros_like(carry_ref)

    xb = x_ref[...].astype(jnp.float32)                      # (TT, Cin)
    window = jnp.concatenate([carry_ref[...], xb], axis=0)   # (TT+_HALO, Cin), aligned

    acc = jnp.zeros((TT, o_ref.shape[-1]), jnp.float32)
    for j in range(K):                        # K static shifted dots (unrolled)
        s = _HALO - (K - 1) + j               # window row feeding output row 0
        acc = acc + jnp.dot(window[s:s + TT, :], w_ref[j],
                            preferred_element_type=jnp.float32)

    o_ref[...] = jnp.tanh(acc + b_ref[...].astype(jnp.float32)).astype(o_ref.dtype)

    # Carry the last _HALO rows of this block into the next time step.
    carry_ref[...] = xb[TT - _HALO:, :]


def context_conv(x, weight, bias, *, max_time_tile=2048):
    """Causal Conv1d + tanh (ContextConv.forward).

    x:      (B, T, Cin)    batch_first
    weight: (Cout, Cin, K) PyTorch conv1d layout
    bias:   (Cout,)
    returns (B, T, Cout)
    """
    B, T, Cin = x.shape
    Cout, Cin_w, K = weight.shape
    assert Cin == Cin_w
    assert 2 <= K <= _HALO + 1, "kernel carries 8 history rows; needs 2 <= k <= 9"
    assert max_time_tile >= 8 and max_time_tile % 8 == 0

    # Time tile: multiple of 8 (sublane) and >= _HALO.  Large tiles amortize the
    # ~0.35us per-grid-step overhead; VMEM stays well under limits on all chips.
    TT = min(max_time_tile, _round_up(T, 8))
    n_t = pl.cdiv(T, TT)

    w_t = jnp.transpose(weight, (2, 1, 0))   # (K, Cin, Cout): w_t[j,c,o] = weight[o,c,j]
    b2 = bias.reshape(1, Cout)

    return pl.pallas_call(
        _context_conv_kernel,
        out_shape=jax.ShapeDtypeStruct((B, T, Cout), x.dtype),
        grid_spec=pltpu.PrefetchScalarGridSpec(
            num_scalar_prefetch=0,
            grid=(B, n_t),
            in_specs=[
                pl.BlockSpec((None, TT, Cin), lambda b, t: (b, t, 0)),
                pl.BlockSpec((K, Cin, Cout), lambda b, t: (0, 0, 0)),
                pl.BlockSpec((1, Cout), lambda b, t: (0, 0)),
            ],
            out_specs=pl.BlockSpec((None, TT, Cout), lambda b, t: (b, t, 0)),
            scratch_shapes=[pltpu.VMEM((_HALO, Cin), jnp.float32)],
        ),
        compiler_params=pltpu.CompilerParams(
            dimension_semantics=("parallel", "arbitrary"),
        ),
    )(x, w_t, b2)


def _reference(x, weight, bias):
    """Pure-JAX reference of the PyTorch forward pass."""
    B, T, Cin = x.shape
    Cout, _, K = weight.shape
    x_pad = jnp.pad(x, ((0, 0), (K - 1, 0), (0, 0)))  # (B, T+K-1, Cin)
    out = jnp.zeros((B, T, Cout), dtype=jnp.float32)
    for j in range(K):
        out = out + jnp.einsum("btc,oc->bto", x_pad[:, j:j + T, :], weight[:, :, j])
    return jnp.tanh(out + bias[None, None, :]).astype(x.dtype)


if __name__ == "__main__":
    # Module defaults: in_channels=25, out_channels=25, k=5; small batch/seq.
    B, T, Cin, Cout, K = 2, 16, 25, 25, 5

    key = jax.random.PRNGKey(0)
    kx, kw, kb = jax.random.split(key, 3)

    x = jax.random.normal(kx, (B, T, Cin), dtype=jnp.float32)
    bound = 1.0 / (Cin * K) ** 0.5
    weight = jax.random.uniform(kw, (Cout, Cin, K), minval=-bound, maxval=bound,
                                dtype=jnp.float32)
    bias = jax.random.uniform(kb, (Cout,), minval=-bound, maxval=bound,
                              dtype=jnp.float32)

    y_ref = _reference(x, weight, bias)

    # Single time block per batch element (TT = 16).
    y = context_conv(x, weight, bias)
    jax.block_until_ready(y)
    assert y.shape == (B, T, Cout)
    assert jnp.allclose(y, y_ref, atol=1e-5, rtol=1e-5), "mismatch vs reference"

    # Force two time blocks per batch element to exercise the carry scratch.
    y2 = context_conv(x, weight, bias, max_time_tile=8)
    jax.block_until_ready(y2)
    assert jnp.allclose(y2, y_ref, atol=1e-5, rtol=1e-5), "mismatch (carry path)"

    print("KERNEL_OK")
</pallas_src>

<mosaic_0001>
module attributes {stable_mosaic.version = 11 : i64} {
  func.func @_context_conv_kernel(%arg0: i32, %arg1: i32, %arg2: memref<1x16x25xf32, #tpu.memory_space<vmem>>, %arg3: memref<5x25x25xf32, #tpu.memory_space<vmem>>, %arg4: memref<1x25xf32, #tpu.memory_space<vmem>>, %arg5: memref<1x16x25xf32, #tpu.memory_space<vmem>>, %arg6: memref<8x25xf32, #tpu.memory_space<vmem>>) attributes {dimension_semantics = [#tpu.dimension_semantics<parallel>, #tpu.dimension_semantics<arbitrary>], iteration_bounds = array<i64: 2, 1>, scalar_prefetch = 0 : i64, scratch_operands = 1 : i64, tpu.core_type = #tpu.core_type<tc>, window_params = [{transform_indices = @transform_0, window_bounds = array<i64: 1, 16, 25>}, {pipeline_mode = #tpu.pipeline_mode<synchronous>, transform_indices = @transform_1, window_bounds = array<i64: 5, 25, 25>}, {pipeline_mode = #tpu.pipeline_mode<synchronous>, transform_indices = @transform_2, window_bounds = array<i64: 1, 25>}, {transform_indices = @transform_3, window_bounds = array<i64: 1, 16, 25>}]} {
    %c0_i32 = arith.constant 0 : i32
    %0 = arith.cmpi eq, %arg1, %c0_i32 : i32
    %1 = arith.extui %0 : i1 to i32
    %c0_i32_0 = arith.constant 0 : i32
    %2 = arith.cmpi ne, %1, %c0_i32_0 : i32
    scf.if %2 {
      %cst_28 = arith.constant 0.000000e+00 : f32
      %42 = vector.broadcast %cst_28 : f32 to vector<8x25xf32>
      %c0_29 = arith.constant 0 : index
      %c0_30 = arith.constant 0 : index
      %43 = vector.load %arg6[%c0_29, %c0_30] : memref<8x25xf32, #tpu.memory_space<vmem>>, vector<8x25xf32>
      tpu.vector_store %arg6[%c0_29, %c0_30], %42 {strides = array<i32>} : memref<8x25xf32, #tpu.memory_space<vmem>>, vector<8x25xf32>,
    } else {
    }
    %c0 = arith.constant 0 : index
    %c0_1 = arith.constant 0 : index
    %c0_2 = arith.constant 0 : index
    %3 = vector.load %arg2[%c0, %c0_1, %c0_2] : memref<1x16x25xf32, #tpu.memory_space<vmem>>, vector<1x16x25xf32>
    %4 = vector.shape_cast %3 : vector<1x16x25xf32> to vector<16x25xf32>
    %c0_3 = arith.constant 0 : index
    %c0_4 = arith.constant 0 : index
    %5 = vector.load %arg6[%c0_3, %c0_4] : memref<8x25xf32, #tpu.memory_space<vmem>>, vector<8x25xf32>
    %6 = tpu.concatenate %5, %4 in 0 : vector<8x25xf32>, vector<16x25xf32> -> vector<24x25xf32>
    %cst = arith.constant 0.000000e+00 : f32
    %7 = vector.broadcast %cst : f32 to vector<16x25xf32>
    %8 = vector.extract_strided_slice %6 {offsets = [4, 0], sizes = [16, 25], strides = [1, 1]} : vector<24x25xf32> to vector<16x25xf32>
    %c0_5 = arith.constant 0 : index
    %c0_6 = arith.constant 0 : index
    %c0_7 = arith.constant 0 : index
    %9 = vector.load %arg3[%c0_5, %c0_6, %c0_7] : memref<5x25x25xf32, #tpu.memory_space<vmem>>, vector<1x25x25xf32>
    %10 = vector.shape_cast %9 : vector<1x25x25xf32> to vector<25x25xf32>
    %cst_8 = arith.constant dense<0.000000e+00> : vector<16x25xf32>
    %11 = tpu.matmul %8, %10, %cst_8 {dimension_numbers = #tpu.dot_dimension_numbers<[1], [0], [0], [1], [0, 0, 1, 1], [], []>} : vector<16x25xf32>, vector<25x25xf32>, vector<16x25xf32> -> vector<16x25xf32>
    %12 = arith.addf %7, %11 : vector<16x25xf32>
    %13 = vector.extract_strided_slice %6 {offsets = [5, 0], sizes = [16, 25], strides = [1, 1]} : vector<24x25xf32> to vector<16x25xf32>
    %c1 = arith.constant 1 : index
    %c0_9 = arith.constant 0 : index
    %c0_10 = arith.constant 0 : index
    %14 = vector.load %arg3[%c1, %c0_9, %c0_10] : memref<5x25x25xf32, #tpu.memory_space<vmem>>, vector<1x25x25xf32>
    %15 = vector.shape_cast %14 : vector<1x25x25xf32> to vector<25x25xf32>
    %cst_11 = arith.constant dense<0.000000e+00> : vector<16x25xf32>
    %16 = tpu.matmul %13, %15, %cst_11 {dimension_numbers = #tpu.dot_dimension_numbers<[1], [0], [0], [1], [0, 0, 1, 1], [], []>} : vector<16x25xf32>, vector<25x25xf32>, vector<16x25xf32> -> vector<16x25xf32>
    %17 = arith.addf %12, %16 : vector<16x25xf32>
    %18 = vector.extract_strided_slice %6 {offsets = [6, 0], sizes = [16, 25], strides = [1, 1]} : vector<24x25xf32> to vector<16x25xf32>
    %c2 = arith.constant 2 : index
    %c0_12 = arith.constant 0 : index
    %c0_13 = arith.constant 0 : index
    %19 = vector.load %arg3[%c2, %c0_12, %c0_13] : memref<5x25x25xf32, #tpu.memory_space<vmem>>, vector<1x25x25xf32>
    %20 = vector.shape_cast %19 : vector<1x25x25xf32> to vector<25x25xf32>
    %cst_14 = arith.constant dense<0.000000e+00> : vector<16x25xf32>
    %21 = tpu.matmul %18, %20, %cst_14 {dimension_numbers = #tpu.dot_dimension_numbers<[1], [0], [0], [1], [0, 0, 1, 1], [], []>} : vector<16x25xf32>, vector<25x25xf32>, vector<16x25xf32> -> vector<16x25xf32>
    %22 = arith.addf %17, %21 : vector<16x25xf32>
    %23 = vector.extract_strided_slice %6 {offsets = [7, 0], sizes = [16, 25], strides = [1, 1]} : vector<24x25xf32> to vector<16x25xf32>
    %c3 = arith.constant 3 : index
    %c0_15 = arith.constant 0 : index
    %c0_16 = arith.constant 0 : index
    %24 = vector.load %arg3[%c3, %c0_15, %c0_16] : memref<5x25x25xf32, #tpu.memory_space<vmem>>, vector<1x25x25xf32>
    %25 = vector.shape_cast %24 : vector<1x25x25xf32> to vector<25x25xf32>
    %cst_17 = arith.constant dense<0.000000e+00> : vector<16x25xf32>
    %26 = tpu.matmul %23, %25, %cst_17 {dimension_numbers = #tpu.dot_dimension_numbers<[1], [0], [0], [1], [0, 0, 1, 1], [], []>} : vector<16x25xf32>, vector<25x25xf32>, vector<16x25xf32> -> vector<16x25xf32>
    %27 = arith.addf %22, %26 : vector<16x25xf32>
    %28 = vector.extract_strided_slice %6 {offsets = [8, 0], sizes = [16, 25], strides = [1, 1]} : vector<24x25xf32> to vector<16x25xf32>
    %c4 = arith.constant 4 : index
    %c0_18 = arith.constant 0 : index
    %c0_19 = arith.constant 0 : index
    %29 = vector.load %arg3[%c4, %c0_18, %c0_19] : memref<5x25x25xf32, #tpu.memory_space<vmem>>, vector<1x25x25xf32>
    %30 = vector.shape_cast %29 : vector<1x25x25xf32> to vector<25x25xf32>
    %cst_20 = arith.constant dense<0.000000e+00> : vector<16x25xf32>
    %31 = tpu.matmul %28, %30, %cst_20 {dimension_numbers = #tpu.dot_dimension_numbers<[1], [0], [0], [1], [0, 0, 1, 1], [], []>} : vector<16x25xf32>, vector<25x25xf32>, vector<16x25xf32> -> vector<16x25xf32>
    %32 = arith.addf %27, %31 : vector<16x25xf32>
    %c0_21 = arith.constant 0 : index
    %c0_22 = arith.constant 0 : index
    %33 = vector.load %arg4[%c0_21, %c0_22] : memref<1x25xf32, #tpu.memory_space<vmem>>, vector<1x25xf32>
    %34 = vector.broadcast %33 : vector<1x25xf32> to vector<16x25xf32>
    %35 = arith.addf %32, %34 : vector<16x25xf32>
    %36 = math.tanh %35 : vector<16x25xf32>
    %c0_23 = arith.constant 0 : index
    %c0_24 = arith.constant 0 : index
    %c0_25 = arith.constant 0 : index
    %37 = vector.load %arg5[%c0_23, %c0_24, %c0_25] : memref<1x16x25xf32, #tpu.memory_space<vmem>>, vector<1x16x25xf32>
    %38 = vector.shape_cast %37 : vector<1x16x25xf32> to vector<16x25xf32>
    %39 = vector.shape_cast %36 : vector<16x25xf32> to vector<1x16x25xf32>
    tpu.vector_store %arg5[%c0_23, %c0_24, %c0_25], %39 {strides = array<i32>} : memref<1x16x25xf32, #tpu.memory_space<vmem>>, vector<1x16x25xf32>,
    %40 = vector.extract_strided_slice %4 {offsets = [8, 0], sizes = [8, 25], strides = [1, 1]} : vector<16x25xf32> to vector<8x25xf32>
    %c0_26 = arith.constant 0 : index
    %c0_27 = arith.constant 0 : index
    %41 = vector.load %arg6[%c0_26, %c0_27] : memref<8x25xf32, #tpu.memory_space<vmem>>, vector<8x25xf32>
    tpu.vector_store %arg6[%c0_26, %c0_27], %40 {strides = array<i32>} : memref<8x25xf32, #tpu.memory_space<vmem>>, vector<8x25xf32>,
    return
  }
  func.func @transform_0(%arg0: i32, %arg1: i32) -> (i32, i32, i32) {
    %c0_i32 = arith.constant 0 : i32
    %c0_i32_0 = arith.constant 0 : i32
    return %arg0, %arg1, %c0_i32 : i32, i32, i32
  }
  func.func @transform_1(%arg0: i32, %arg1: i32) -> (i32, i32, i32) {
    %c0_i32 = arith.constant 0 : i32
    %c0_i32_0 = arith.constant 0 : i32
    %c0_i32_1 = arith.constant 0 : i32
    %c0_i32_2 = arith.constant 0 : i32
    return %c0_i32, %c0_i32_0, %c0_i32_1 : i32, i32, i32
  }
  func.func @transform_2(%arg0: i32, %arg1: i32) -> (i32, i32) {
    %c0_i32 = arith.constant 0 : i32
    %c0_i32_0 = arith.constant 0 : i32
    %c0_i32_1 = arith.constant 0 : i32
    return %c0_i32, %c0_i32_0 : i32, i32
  }
  func.func @transform_3(%arg0: i32, %arg1: i32) -> (i32, i32, i32) {
    %c0_i32 = arith.constant 0 : i32
    %c0_i32_0 = arith.constant 0 : i32
    return %arg0, %arg1, %c0_i32 : i32, i32, i32
  }
}

</mosaic_0001>

<bundles_post_ra>
// kernel: tpu_custom_call.1
= control target key start
LH: loop header
LB: loop body
LE: loop exit
PB: predicated region body
PF: predicated region fallthrough
CT: control target
= control target key end

     0   :  { %8 = vsyncpa [#allocation4], 0  ;;  %s1558_s0 = inlined_call_operand.hbm [shape: f32[2,16,25], index: 0, kind: input, shape index: {}]   ;;  %s1559_s1 = inlined_call_operand.hbm [shape: f32[5,25,25], index: 1, kind: input, shape index: {}]   ;;  %s1560_s2 = inlined_call_operand.vmem [shape: f32[1,25], index: 2, kind: input, shape index: {}]   ;;  %s1561_s3 = inlined_call_operand.hbm [shape: f32[2,16,25], index: 3, kind: output, shape index: {}]  }
   0x1   :  { %10 = vsyncpa [#allocation4 + $0x1], 0 }
   0x2   :  { %11 = vsyncpa [#allocation7], 0 }
   0x3   :  { %12 = vsyncpa [#allocation5], 0 }
   0x4   :  { %14 = vsyncpa [#allocation5 + $0x1], 0  ;;  %s1264_s12 = smov 0   ;;  %s1266_s13 = smov 0  }
   0x5   :  { %s1268_s14 = smov 0   ;;  %s1270_s15 = smov 0  }
   0x6   :  { %s1272_s16 = smov 0   ;;  %s1274_s17 = smov 0  }
   0x7 LB: > { %s828_s18 = sadd.s32 4294967295, %s1233_s17   ;;  %s829_s19 = sadd.s32 4294967294, %s1233_s17   ;;  %s1233_s17 = sphi %s1274_s17, %s20_s17   ;;  %s1229_s16 = sphi %s1272_s16, %s1587_s16   ;;  %s1225_s15 = sphi %s1270_s15, %s1586_s15   ;;  %s1221_s14 = sphi %s1268_s14, %s1585_s14   ;;  %s1217_s13 = sphi %s1266_s13, %s1584_s13   ;;  %s1213_s12 = sphi %s1264_s12, %s1583_s12  }
   0x8   : > { %p54_p0 = scmp.ne.s32.totalorder %s1217_s13, %s1213_s12  ;;  %p1298_p1 = scmp.eq.s32.totalorder %s828_s18, 0 }
   0x9   : > { %p1302_p2 = scmp.eq.s32.totalorder %s828_s18, 1  ;;  %p128_p3 = scmp.eq.s32.totalorder %s829_s19, 1 }
   0xa   : > { %s1566_s20 = scalar_select %p1298_p1, 1, 0 }
   0xb   : > { %s1567_s21 = scalar_select %p1302_p2, 1, 0 }
   0xc   : > { %p1308_p4 = por %p1298_p1, %p54_p0  ;;  %p830_p5 = scmp.ge.s32.totalorder %s1233_s17, 1 }
   0xd   : > { %p1313_p6 = por %p128_p3, %p54_p0  ;;  %p135_p7 = scmp.lt.s32.totalorder %s1233_s17, 3 }
   0xe   : > { %s1568_s22 = scalar_select %p1308_p4, 1, 0 }
   0xf   : > { %s1569_s23 = scalar_select %p1313_p6, 1, 0 }
  0x10   : > { %p1318_p8 = pnand %p830_p5, %p135_p7  ;;  %s1235_s25 = smov [#allocation6]  }
  0x11   : > { %s147_s26 = sshll.u32 %s1235_s25, 4  ;;  %s32_s28 = sadd.s32 1, %s1229_s16  ;;  %s148_s26 = int_to_ptr.vmem [resolvable:$true] %s147_s26 }
  0x12   : > { %s1570_s24 = scalar_select %p1318_p8, 1, 0 }
  0x13   : > { %p1014_p9 = pneg %p1318_p8  ;;  %s1089_s4 = scalar_lea.hbm %s1559_s1, 2560 }
  0x14   : > { %p1090_p12 = scmp.ne.s32.totalorder %s1559_s1, %s1089_s4  ;;  %p1096_p5 = scmp.lt.u32.totalorder %s1089_s4, %s1559_s1 }
  0x15   : > { %p1327_p11 = pnand %p1014_p9, %p1298_p1 }
  0x17   : > { %p1091_p13 = pneg %p1327_p11 }
  0x19   : > { %p1092_p0 = pnand %p1091_p13, %p1090_p12 }
  0x1b   : > { %p1093_p3 = pneg %p1092_p0 }
  0x1d   : > { %p1098_p7 = pnand %p1096_p5, %p1093_p3 }
  0x1f   : > { %1101 = shalt.err (!%p1098_p7)
}
  0x20   : > { %s1102_s9 = scalar_lea.vmem %s148_s26, 2560  ;;  %p1110_p1 = scmp.lt.s32.totalorder %s148_s26, %s148_s26 }
  0x21   : > { %p1103_p9 = scmp.ne.s32.totalorder %s148_s26, %s1102_s9  ;;  %p1111_p4 = scmp.lt.s32.totalorder %s1102_s9, %s1102_s9 }
  0x23   : > { %p1105_p10 = pnand %p1103_p9, %p1091_p13  ;;  %p1112_p8 = por %p1111_p4, %p1110_p1 }
  0x25   : > { %p1106_p6 = pneg %p1105_p10 }
  0x27   : > { %p1113_p2 = pnand %p1112_p8, %p1106_p6 }
  0x29   : > { %1116 = shalt.err (!%p1113_p2)
}
  0x2a   : > { %s1236_s10 = smov 128   ;;  %s1237_s11 = smov 8  }
  0x2b   : > { %1017 = dma.hbm_to_vmem [thread:$0]  (!%p1327_p11), %s1559_s1, 2560, %s148_s26, [#allocation7], %s1236_s10, %s1236_s10, %s1237_s11  }
  0x2c   : > { %p34_p1 = scmp.ge.s32.totalorder %s32_s28, 2  ;;  %s41_s25 = sadd.s32 1, %s1221_s14 }
  0x2d   : > { %p48_p2 = scmp.ne.s32.totalorder %s1221_s14, %s1217_s13  ;;  %p49_p4 = scmp.eq.s32.totalorder %s1233_s17, 0 }
  0x2e   : > { %s1589_s28 = smov (%p34_p1, %s32_s28), 0  ;;  %p1573_p8 = scmp.ne.s32.totalorder %s1567_s21, 0 }
  0x2f   : > { %p1357_p6 = por %p49_p4, %p48_p2  ;;  %s36_s30 = ssub.s32 %s1229_s16, %s1589_s28 }
  0x30   : > { %p1363_p10 = por %p1573_p8, %p48_p2  ;;  %p1027_p12 = scmp.lt.s32.totalorder %s1233_s17, 2 }
  0x31   : > { %p39_p11 = scmp.eq.s32.totalorder %s36_s30, 0  ;;  %s164_s26 = sand.u32 1, %s1221_s14  }
  0x32   : > { %s833_s4 = sshll.u32 %s164_s26, 4  ;;  %s861_s6 = sshll.u32 %s1229_s16, 8 }
  0x33   : > { %s1372_s5 = scalar_select %p39_p11, %s1221_s14, %s41_s25  }
  0x34   : > { %s1378_s9 = scalar_lea.hbm %s1558_s0, %s861_s6  ;;  %s168_s21 = scalar_lea.vmem [#allocation3], %s833_s4 }
  0x35   : > { %s177_s18 = sshll.u32 %s168_s21, 4  ;;  %p1384_p13 = pnand %p1027_p12, %p1357_p6  ;;  %s1380_s18 = int_to_ptr.vmem [resolvable:$true] %s177_s18 }
  0x36   : > { %s1388_s25 = scalar_lea.sflag [#allocation4], %s164_s26  ;;  %s1117_s30 = scalar_lea.hbm %s1378_s9, 256 }
  0x37   : > { %p1118_p0 = scmp.ne.s32.totalorder %s1378_s9, %s1117_s30  ;;  %p1119_p3 = pneg %p1384_p13 }
  0x38   : > { %s1122_s29 = scalar_lea.hbm %s1558_s0, 512  ;;  %p1123_p9 = scmp.lt.u32.totalorder %s1378_s9, %s1558_s0 }
  0x39   : > { %p1120_p5 = pnand %p1119_p3, %p1118_p0  ;;  %p1124_p1 = scmp.lt.u32.totalorder %s1122_s29, %s1117_s30 }
  0x3a   : > { %p1126_p4 = scmp.lt.u32.totalorder %s1117_s30, %s1378_s9 }
  0x3b   : > { %p1121_p7 = pneg %p1120_p5  ;;  %p1125_p2 = por %p1124_p1, %p1123_p9 }
  0x3d   : > { %p1127_p6 = por %p1126_p4, %p1125_p2 }
  0x3f   : > { %p1128_p8 = pnand %p1127_p6, %p1121_p7 }
  0x41   : > { %1131 = shalt.err (!%p1128_p8)
}
  0x42   : > { %s1132_s26 = scalar_lea.vmem %s1380_s18, 256  ;;  %s1238_s21 = smov [#allocation3]  }
  0x43   : > { %p1133_p12 = scmp.ne.s32.totalorder %s1380_s18, %s1132_s26  ;;  %s1137_s4 = sshll.u32 %s1238_s21, 4  ;;  %s1138_s4 = int_to_ptr.vmem [resolvable:$false] %s1137_s4 }
  0x44   : > { %s1139_s6 = scalar_lea.vmem %s1138_s4, 512  ;;  %p1140_p5 = scmp.lt.s32.totalorder %s1380_s18, %s1138_s4 }
  0x45   : > { %p1135_p11 = pnand %p1133_p12, %p1119_p3  ;;  %p1141_p9 = scmp.lt.s32.totalorder %s1139_s6, %s1132_s26 }
  0x47   : > { %p1136_p0 = pneg %p1135_p11  ;;  %p1142_p1 = por %p1141_p9, %p1140_p5 }
  0x49   : > { %p1143_p2 = pnand %p1142_p1, %p1136_p0 }
  0x4b   : > { %1146 = shalt.err (!%p1143_p2)
}
  0x4c   : > { %1021 = dma.hbm_to_vmem [thread:$0]  (!%p1384_p13), %s1378_s9, 256, %s1380_s18, %s1388_s25, %s1236_s10, %s1236_s10, %s1237_s11  }
  0x4d   : > { %p1576_p3 = scmp.ne.s32.totalorder %s1570_s24, 0 }
  0x4e   : > { %s1422_s30 = sand.u32 (!%p1576_p3), 1, %s1217_s13   ;;  %p1577_p7 = scmp.ne.s32.totalorder (!%p1576_p3), %s1568_s22, 0 }
  0x4f   : > { %189 = sbr.rel (%p1576_p3) target bundleno = 362 (0x16a), region = 32  ;;  %s837_s29 = sshll.u32 (!%p1576_p3), %s1422_s30, 4 }
  0x50   : > { %s192_s7 = scalar_lea.sflag (!%p1576_p3), [#allocation4], %s1422_s30  ;;  %s195_s19 = scalar_lea.vmem (!%p1576_p3), [#allocation3], %s837_s29 }
  0x56   : > { %1200 = dma.done.wait (%p1577_p7), %s192_s7, 256  }
  0x57   : > { %1202 = vsyncadd (%p1577_p7), %s192_s7, 4294967040  ;;  %p1578_p13 = scmp.ne.s32.totalorder %s1566_s20, 0 }
  0x59   : > { %1204 = dma.done.wait (%p1578_p13), [#allocation7], 2560  }
  0x5a   : > { %1206 = vsyncadd (%p1578_p13), [#allocation7], 4294964736  ;;  %vm228_vm0 = vcmask 203776   ;;  %v1239_v0 = vmov 0.0   ;;  %vm256_vm1 = vcmask 1040384   ;;  %vm1240_vm2 = vmmov 1  }
  0x5b   : > { %229 = vst.msk [vmem:[#allocation2] sm:$0xff] %vm228_vm0, %v1239_v0  ;;  %vm1438_vm3 = vmpackc.low %vm256_vm1, %vm1240_vm2  ;;  %v238_v2 = vld [vmem:[#allocation6 + $0x20] sm:$0xff]  ;;  %v239_v3 = vld [vmem:[#allocation6 + $0x28] sm:$0xff]  ;;  %vm245_vm4 = vcmask 1042432   ;;  %vm428_vm5 = vcmask 1041408   ;;  %vm335_vm6 = vcmask 1043456  }
  0x5c   : > { %v424_v4 = vld [vmem:[#allocation6 + $0x40] sm:$0xff]  ;;  %v948_v5 = vpack.c.bf16 %v239_v3, %v238_v2  ;;  %v425_v6 = vld [vmem:[#allocation6 + $0x48] sm:$0xff]  ;;  %v240_v7 = vld [vmem:[#allocation6 + $0x30] sm:$0xff]  ;;  %s862_s24 = sshll.u32 %s1225_s15, 8  ;;  %s221_s10 = scalar_lea.vmem [#allocation8], %s837_s29 }
  0x5d   : > { %v241_v8 = vld [vmem:[#allocation6 + $0x38] sm:$0x1]  ;;  %v968_v9 = vpack.c.bf16 %v425_v6, %v424_v4  ;;  %v426_v11 = vld [vmem:[#allocation6 + $0x50] sm:$0xff]  ;;  %v233_v19 = vld [vmem:[#allocation6] sm:$0xff]  ;;  %s731_s11 = sshll.u32 %s221_s10, 4  ;;  %s1505_s25 = scalar_lea.hbm %s1561_s3, %s862_s24  ;;  %s1507_s11 = int_to_ptr.vmem [resolvable:$true] %s731_s11 }
  0x5e   : > { %v952_v10 = vpack.c.bf16 %v241_v8, %v240_v7  ;;  %v427_v12 = vld [vmem:[#allocation6 + $0x58] sm:$0x1]  ;;  %v1442_v13 = vld [vmem:[%s195_s19] sm:$0xff]  ;;  %949 = vmatprep.subr.bf16.mxu1 %v948_v5  ;;  %v234_v23 = vld [vmem:[#allocation6 + $0x8] sm:$0xff]  ;;  %s716_s15 = scalar_lea.sflag [#allocation5], %s1422_s30  ;;  %s1147_s8 = scalar_lea.vmem %s1507_s11, 256 }
  0x5f   : > { %v972_v14 = vpack.c.bf16 %v427_v12, %v426_v11  ;;  %v247_v16 = vrot.slane %v1442_v13, 5  ;;  %v430_v17 = vrot.slane %v1442_v13, 6  ;;  %v1446_v18 = vld [vmem:[%s195_s19 + $0x8] sm:$0xff]  ;;  %969 = vmatprep.subr.bf16.mxu0 %v968_v9  ;;  %951 = vmatpush3.bf16.msra.mxu1 %v948_v5  ;;  %v519_v24 = vld [vmem:[#allocation6 + $0x60] sm:$0xff]  ;;  %v958_v25 = vpack.c.bf16 %v234_v23, %v233_v19  ;;  %v235_v30 = vld [vmem:[#allocation6 + $0x10] sm:$0xff]  ;;  %p1148_p4 = scmp.ne.s32.totalorder %s1507_s11, %s1147_s8  ;;  %s1241_s26 = smov [#allocation8]  }
  0x60   : > { %v249_v22 = vrot.slane %v1446_v18, 5  ;;  %971 = vmatpush3.bf16.msra.mxu0 %v968_v9  ;;  %954 = vmatprep.subr.msk.bf16.mxu1 %vm1438_vm3, %v952_v10  ;;  %v432_v26 = vrot.slane %v1446_v18, 6  ;;  %v520_v27 = vld [vmem:[#allocation6 + $0x68] sm:$0xff]  ;;  %v236_v31 = vld [vmem:[#allocation6 + $0x18] sm:$0x1]  ;;  %v521_v33 = vld [vmem:[#allocation6 + $0x70] sm:$0xff] }
  0x61   : > { %974 = vmatprep.subr.msk.bf16.mxu0 %vm1438_vm3, %v972_v14  ;;  %v978_v32 = vpack.c.bf16 %v520_v27, %v519_v24  ;;  %v522_v34 = vld [vmem:[#allocation6 + $0x78] sm:$0x1]  ;;  %v337_v36 = vrot.slane %v1442_v13, 4  ;;  %v524_v39 = vrot.slane %v1442_v13, 7  ;;  %v962_v41 = vpack.c.bf16 %v236_v31, %v235_v30  ;;  %v613_v44 = vld [vmem:[#allocation6 + $0x80] sm:$0xff]  ;;  %v614_v45 = vld [vmem:[#allocation6 + $0x88] sm:$0xff]  ;;  %p1149_p6 = pnand %p1148_p4, %p1363_p10 }
  0x62   : > { %v232_v15 = vld [vmem:[#allocation2] sm:$0xff]  ;;  %v250_v37 = vsel %vm245_vm4, %v247_v16, %v249_v22  ;;  %v433_v40 = vsel %vm428_vm5, %v430_v17, %v432_v26  ;;  %v982_v42 = vpack.c.bf16 %v522_v34, %v521_v33  ;;  %v339_v47 = vrot.slane %v1446_v18, 4  ;;  %v615_v50 = vld [vmem:[#allocation6 + $0x90] sm:$0xff]  ;;  %s1151_s21 = sshll.u32 %s1241_s26, 4  ;;  %s1152_s21 = int_to_ptr.vmem [resolvable:$false] %s1151_s21 }
  0x63   : > { %v246_v20 = vrot.slane %v232_v15, 5  ;;  %v429_v21 = vrot.slane %v232_v15, 6  ;;  %714 = vst.msk [vmem:[#allocation2] sm:$0xff] %vm228_vm0, %v1446_v18  ;;  %v336_v35 = vrot.slane %v232_v15, 4  ;;  %957 = vmatpush3.bf16.msk.msra.mxu1 %vm1438_vm3, %v952_v10  ;;  %v523_v38 = vrot.slane %v232_v15, 7  ;;  %p1150_p8 = pneg %p1149_p6  ;;  %s1153_s4 = scalar_lea.vmem %s1152_s21, 512 }
  0x64   : > { %977 = vmatpush3.bf16.msk.msra.mxu0 %vm1438_vm3, %v972_v14  ;;  %959 = vmatprep.subr.bf16.mxu1 %v958_v25  ;;  %v526_v48 = vrot.slane %v1446_v18, 7  ;;  %v988_v49 = vpack.c.bf16 %v614_v45, %v613_v44  ;;  %v616_v51 = vld [vmem:[#allocation6 + $0x98] sm:$0x1]  ;;  %v340_v52 = vsel %vm335_vm6, %v337_v36, %v339_v47  ;;  %p1154_p12 = scmp.lt.s32.totalorder %s1507_s11, %s1152_s21  ;;  %p1155_p11 = scmp.lt.s32.totalorder %s1153_s4, %s1147_s8 }
  0x65   : > { %v248_v28 = vsel %vm245_vm4, %v246_v20, %v247_v16  ;;  %v431_v29 = vsel %vm428_vm5, %v429_v21, %v430_v17  ;;  %979 = vmatprep.subr.bf16.mxu0 %v978_v32  ;;  %v338_v43 = vsel %vm335_vm6, %v336_v35, %v337_v36  ;;  %v525_v46 = vsel %vm256_vm1, %v523_v38, %v524_v39  ;;  %v855_v58 = vld [vmem:[%s1560_s2] ss:$0 sm:$0xff] }
  0x66   : > { %901 = vmatprep.mubr.msk.f32.mxu1 %vm228_vm0, %v248_v28  ;;  %923 = vmatprep.mubr.msk.f32.mxu0 %vm228_vm0, %v431_v29  ;;  %v527_v53 = vsel %vm256_vm1, %v524_v39, %v526_v48  ;;  %v992_v54 = vpack.c.bf16 %v616_v51, %v615_v50  ;;  %p1156_p0 = por %p1155_p11, %p1154_p12 }
  0x67   : > { %902 = vmatmul.mubr.msk.f32.vlgmr.msra.gmra.mrb[0].mxu1 %vm228_vm0, %v250_v37  ;;  %924 = vmatmul.mubr.msk.f32.vlgmr.msra.gmra.mrb[0].mxu0 %vm228_vm0, %v433_v40 }
  0x68   : > { %961 = vmatpush3.bf16.msra.mxu1 %v958_v25  ;;  %981 = vmatpush3.bf16.msra.mxu0 %v978_v32  ;;  %p1157_p5 = pnand %p1156_p0, %p1150_p8 }
  0x69   : > { %964 = vmatprep.subr.msk.bf16.mxu1 %vm1438_vm3, %v962_v41  ;;  %984 = vmatprep.subr.msk.bf16.mxu0 %vm1438_vm3, %v982_v42 }
  0x6a   : > { %912 = vmatprep.mubr.msk.f32.mxu1 %vm228_vm0, %v338_v43  ;;  %934 = vmatprep.mubr.msk.f32.mxu0 %vm228_vm0, %v525_v46 }
  0x6c   : > { %967 = vmatpush3.bf16.msk.msra.mxu1 %vm1438_vm3, %v962_v41  ;;  %987 = vmatpush3.bf16.msk.msra.mxu0 %vm1438_vm3, %v982_v42 }
  0x6d   : > { %989 = vmatprep.subr.bf16.mxu0 %v988_v49 }
  0x6f   : > { %913 = vmatmul.mubr.msk.f32.vlgmr.msra.gmra.mrb[0].mxu1 %vm228_vm0, %v340_v52  ;;  %935 = vmatmul.mubr.msk.f32.vlgmr.msra.gmra.mrb[0].mxu0 %vm228_vm0, %v527_v53 }
  0x70   : > { %991 = vmatpush3.bf16.msra.mxu0 %v988_v49  ;;  %945 = vmatprep.mubr.msk.f32.mxu0 %vm228_vm0, %v1442_v13 }
  0x71   : > { %994 = vmatprep.subr.msk.bf16.mxu0 %vm1438_vm3, %v992_v54 }
  0x74   : > { %997 = vmatpush3.bf16.msk.msra.mxu0 %vm1438_vm3, %v992_v54 }
  0x77   : > { %946 = vmatmul.mubr.msk.f32.vlgmr.msra.gmra.mrb[0].mxu0 %vm228_vm0, %v1446_v18 }
 0x142   : > { %v914_v55 = vpop.f32.mrb[0].mxu1 }
 0x143   : > { %v414_v56 = vpop.f32.mrb[1].mxu1 }
 0x14a   : > { %v947_v57 = vpop.f32.mrb[0].mxu0 }
 0x14b   : > { %v998_v59 = vadd.f32 %v947_v57, %v914_v55  ;;  %v690_v60 = vpop.f32.mrb[1].mxu0 }
 0x14c   : > { %v999_v61 = vadd.f32 %v690_v60, %v414_v56 }
 0x14d   : > { %v709_v62 = vadd.f32 %v998_v59, %v855_v58 }
 0x14e   : > { %v708_v63 = vadd.f32 %v999_v61, %v855_v58 }
 0x14f   : > { %1085 = vtanh.f32 %v709_v62 }
 0x150   : > { %1087 = vtanh.f32 %v708_v63 }
 0x159   : > { %v1086_v0 = vpop.eup %1085 }
 0x15a   : > { %v1088_v1 = vpop.eup %1087  ;;  %713 = vst.msk [vmem:[%s221_s10 + $0x8] sm:$0xff] %vm228_vm0, %v1086_v0 }
 0x15b   : > { %712 = vst.msk [vmem:[%s221_s10] sm:$0xff] %vm228_vm0, %v1088_v1 }
 0x15c   : > { %1160 = shalt.err (!%p1157_p5)
}
 0x15d   : > { %s1161_s6 = scalar_lea.hbm %s1505_s25, 256  ;;  %s1165_s19 = scalar_lea.hbm %s1561_s3, 512 }
 0x15e   : > { %p1162_p9 = scmp.ne.s32.totalorder %s1505_s25, %s1161_s6  ;;  %p1166_p3 = scmp.lt.u32.totalorder %s1505_s25, %s1561_s3 }
 0x15f   : > { %p1167_p7 = scmp.lt.u32.totalorder %s1165_s19, %s1161_s6  ;;  %p1169_p4 = scmp.lt.u32.totalorder %s1161_s6, %s1505_s25 }
 0x160   : > { %p1163_p1 = pnand %p1162_p9, %p1363_p10 }
 0x161   : > { %p1168_p13 = por %p1167_p7, %p1166_p3 }
 0x162   : > { %p1164_p2 = pneg %p1163_p1 }
 0x163   : > { %p1170_p6 = por %p1169_p4, %p1168_p13 }
 0x165   : > { %p1171_p8 = pnand %p1170_p6, %p1164_p2 }
 0x167   : > { %1174 = shalt.err (!%p1171_p8)
}
 0x168   : > { %s1242_s24 = smov 128   ;;  %s1243_s10 = smov 8  }
 0x169   : > { %1012 = dma.vmem_to_hbm [thread:$0]  (%p1363_p10), %s1507_s11, 256, %s1505_s25, %s716_s15, %s1242_s24, %s1242_s24, %s1243_s10  }
 0x16a PF: > { %s746_s9 = sand.u32 1, %s1213_s12   ;;  %p1581_p12 = scmp.ne.s32.totalorder %s1569_s23, 0 }
 0x16b   : > { %p1582_p11 = scmp.ge.s32.totalorder %s1233_s17, 2  ;;  %s747_s18 = scalar_lea.sflag [#allocation5], %s746_s9 }
 0x16d   : > { %p1023_p0 = pnand %p1582_p11, %p1581_p12 }
 0x16f   : > { %1208 = dma.done.wait (!%p1023_p0), %s747_s18, 256  }
 0x170   : > { %1210 = vsyncadd (!%p1023_p0), %s747_s18, 4294967040  ;;  %s20_s17 = sadd.s32 1, %s1233_s17   ;;  %s1583_s12 = smov %s1217_s13 }
 0x171   : > { %p17_p5 = scmp.ge.s32.totalorder %s20_s17, 4   ;;  %s1584_s13 = smov %s1221_s14 }
 0x172   : > { %s1585_s14 = smov %s1372_s5  ;;  %s1586_s15 = smov %s1229_s16 }
 0x173   : > { %s1587_s16 = smov %s1589_s28  ;;  %19 = sbr.rel (!%p17_p5) target bundleno = 7 (0x7), region = 89 }
 0x17a   :  { %752 = vsyncpa [#allocation4], 1 }
 0x17b   :  { %754 = vsyncpa [#allocation4 + $0x1], 1 }
 0x17c   :  { %755 = vsyncpa [#allocation7], 1 }
 0x17d   :  { %756 = vsyncpa [#allocation5], 1 }
 0x17e   :  { %758 = vsyncpa [#allocation5 + $0x1], 1 }

</bundles_post_ra>
